<compile_context>
chip_gen: v7x
topology: tpu7x:2x2x1
jax: 0.10.0
libtpu: 0.0.40
codegen_flags: <defaults>
</compile_context>

<pallas_src>
import math

import jax
import jax.numpy as jnp
from jax.experimental import pallas as pl
from jax.experimental.pallas import tpu as pltpu


NEG_SLOPE = 0.2


def _fuse_kernel(wh_ref, s_ref, w_wh_ref, w_s_ref, b_ref, o_ref):
    # wh_ref: (TN, G) f32        w_wh_ref: (G, G) bf16
    # s_ref:  (TN, S) f32        w_s_ref:  (S, G) bf16
    # b_ref:  (1, G)  f32        o_ref:    (TN, G) bf16
    cdt = w_wh_ref.dtype
    wh = wh_ref[...].astype(cdt)           # in-kernel cast: no extra HBM round trip
    s = s_ref[...].astype(cdt)
    y = jnp.dot(wh, w_wh_ref[...], preferred_element_type=jnp.float32)
    y = y + jnp.dot(s, w_s_ref[...], preferred_element_type=jnp.float32)
    y = y + b_ref[...]
    # LeakyReLU(0.2) == max(y, 0.2*y) for 0 < slope < 1; keep in f32.
    o_ref[...] = jnp.maximum(y, NEG_SLOPE * y).astype(o_ref.dtype)


def prepare_fuse_params(weight, bias, global_embed_dim, *, compute_dtype=jnp.bfloat16):
    """One-time weight prep (hoist out of the per-step hot path).

    weight: (G, G+S) PyTorch nn.Linear layout, bias: (G,).
    Returns:
      w_wh: (G, G) transposed wh-half in compute_dtype
      w_s:  (S, G) transposed s-half in compute_dtype
      b2:   (1, G) f32 bias
    No output-dim padding: the kernel stores G-wide blocks directly, which for
    small G writes far fewer HBM bytes than a 128-padded slab + slice pass.
    """
    G = global_embed_dim
    S = weight.shape[1] - G
    w_t = weight.T.astype(compute_dtype)        # (G+S, G)
    w_wh = w_t[:G]                              # (G, G)
    w_s = w_t[G:]                               # (S, G)
    b2 = bias.astype(jnp.float32).reshape(1, G) # (1, G)
    return w_wh, w_s, b2


def _pick_tile_n(N, *, target=1024, min_steps=4):
    """Row-tile size: multiple of 16 (or == N), aims for >= min_steps grid steps
    (so v7x's two TensorCores both get work) while capping rows/step at `target`
    (big tiles amortize per-step overhead; VMEM/step stays tiny at these widths)."""
    if N <= 4 * 16:
        return N                                # tiny batch: single full block
    t = min(pl.cdiv(N, min_steps), target)
    t = max(16, (t // 16) * 16)                 # round down -> keeps >= min_steps steps
    return t


def fuse_embeddings_prepared(wh, s, w_wh, w_s, b2, *, tile_n=None,
                             out_dtype=jnp.bfloat16):
    N, G = wh.shape
    S = s.shape[-1]
    assert w_wh.shape == (G, G) and w_s.shape == (S, G) and b2.shape == (1, G)

    if tile_n is None:
        tile_n = _pick_tile_n(N)
    assert tile_n == N or tile_n % 16 == 0
    # Ragged-safe grid: rows are independent, so the tail block's OOB rows are
    # simply masked on writeback.
    grid = (pl.cdiv(N, tile_n),)

    in_b = jnp.dtype(wh.dtype).itemsize
    w_b = jnp.dtype(w_wh.dtype).itemsize
    out_b = jnp.dtype(out_dtype).itemsize
    cost = pl.CostEstimate(
        flops=2 * N * (G + S) * G,
        transcendentals=0,
        bytes_accessed=N * (G + S) * in_b        # activations (read once, cast in-kernel)
        + (G + S) * G * w_b + G * 4              # weights + bias (resident)
        + N * G * out_b,                         # unpadded output
    )

    return pl.pallas_call(
        _fuse_kernel,
        out_shape=jax.ShapeDtypeStruct((N, G), out_dtype),
        grid_spec=pltpu.PrefetchScalarGridSpec(
            num_scalar_prefetch=0,
            grid=grid,
            in_specs=[
                pl.BlockSpec((tile_n, G), lambda i: (i, 0)),   # wh row tile (f32)
                pl.BlockSpec((tile_n, S), lambda i: (i, 0)),   # s row tile  (f32)
                pl.BlockSpec((G, G), lambda i: (0, 0)),        # resident weight (wh half)
                pl.BlockSpec((S, G), lambda i: (0, 0)),        # resident weight (s half)
                pl.BlockSpec((1, G), lambda i: (0, 0)),        # bias
            ],
            out_specs=pl.BlockSpec((tile_n, G), lambda i: (i, 0)),
        ),
        compiler_params=pltpu.CompilerParams(
            dimension_semantics=("parallel",),
            vmem_limit_bytes=32 * 1024 * 1024,   # fits v7x (64 MiB) as well as v5e/v6e
        ),
        cost_estimate=cost,
    )(wh, s, w_wh, w_s, b2)


def fuse_embeddings(wh, s, weight, bias, *, tile_n=None,
                    compute_dtype=jnp.bfloat16, out_dtype=jnp.bfloat16):
    """Convenience: prep + kernel. In a real model call prepare_fuse_params() once."""
    G = wh.shape[-1]
    w_wh, w_s, b2 = prepare_fuse_params(weight, bias, G, compute_dtype=compute_dtype)
    return fuse_embeddings_prepared(wh, s, w_wh, w_s, b2, tile_n=tile_n,
                                    out_dtype=out_dtype)


def _torch_linear_init(key, out_features, in_features, dtype=jnp.float32):
    """Deterministic init matching nn.Linear defaults (kaiming-uniform a=sqrt(5))."""
    kw, kb = jax.random.split(key)
    bound = 1.0 / math.sqrt(in_features)
    weight = jax.random.uniform(kw, (out_features, in_features), dtype, -bound, bound)
    bias = jax.random.uniform(kb, (out_features,), dtype, -bound, bound)
    return weight, bias


def _reference(wh, s, weight, bias):
    y = jnp.concatenate([wh, s], axis=-1) @ weight.T + bias
    return jnp.where(y >= 0, y, NEG_SLOPE * y)


if __name__ == "__main__":
    key = jax.random.PRNGKey(0)
    k_wh, k_s, k_p = jax.random.split(key, 3)

    # batch=8, global_embed_dim=32, s_embed_dim=32 (consistent with the module).
    N, G, S = 8, 32, 32
    wh = jax.random.normal(k_wh, (N, G), jnp.float32)
    s = jax.random.normal(k_s, (N, S), jnp.float32)
    weight, bias = _torch_linear_init(k_p, G, G + S)

    out = jax.block_until_ready(fuse_embeddings(wh, s, weight, bias))
    ref = _reference(wh, s, weight, bias)
    assert out.shape == (N, G) and out.dtype == jnp.bfloat16
    out_f = out.astype(jnp.float32)
    assert jnp.allclose(out_f, ref, atol=5e-2, rtol=5e-2), float(jnp.max(jnp.abs(out_f - ref)))

    # Ragged-N path: N=200 -> tile_n=48, grid=5 with a masked tail block.
    N2 = 200
    wh2 = jax.random.normal(k_wh, (N2, G), jnp.float32)
    s2 = jax.random.normal(k_s, (N2, S), jnp.float32)
    out2 = jax.block_until_ready(fuse_embeddings(wh2, s2, weight, bias))
    ref2 = _reference(wh2, s2, weight, bias)
    assert out2.shape == (N2, G)
    out2_f = out2.astype(jnp.float32)
    assert jnp.allclose(out2_f, ref2, atol=5e-2, rtol=5e-2), \
        float(jnp.max(jnp.abs(out2_f - ref2)))

    print("KERNEL_OK")
</pallas_src>

<mosaic_0001>
module attributes {stable_mosaic.version = 11 : i64} {
  func.func @_fuse_kernel(%arg0: i32, %arg1: memref<8x32xf32, #tpu.memory_space<vmem>>, %arg2: memref<8x32xf32, #tpu.memory_space<vmem>>, %arg3: memref<32x32xbf16, #tpu.memory_space<vmem>>, %arg4: memref<32x32xbf16, #tpu.memory_space<vmem>>, %arg5: memref<1x32xf32, #tpu.memory_space<vmem>>, %arg6: memref<8x32xbf16, #tpu.memory_space<vmem>>) attributes {dimension_semantics = [#tpu.dimension_semantics<parallel>], iteration_bounds = array<i64: 1>, scalar_prefetch = 0 : i64, scratch_operands = 0 : i64, tpu.core_type = #tpu.core_type<tc>, window_params = [{transform_indices = @transform_0, window_bounds = array<i64: 8, 32>}, {transform_indices = @transform_1, window_bounds = array<i64: 8, 32>}, {pipeline_mode = #tpu.pipeline_mode<synchronous>, transform_indices = @transform_2, window_bounds = array<i64: 32, 32>}, {pipeline_mode = #tpu.pipeline_mode<synchronous>, transform_indices = @transform_3, window_bounds = array<i64: 32, 32>}, {pipeline_mode = #tpu.pipeline_mode<synchronous>, transform_indices = @transform_4, window_bounds = array<i64: 1, 32>}, {transform_indices = @transform_5, window_bounds = array<i64: 8, 32>}]} {
    %c0 = arith.constant 0 : index
    %c0_0 = arith.constant 0 : index
    %0 = vector.load %arg1[%c0, %c0_0] : memref<8x32xf32, #tpu.memory_space<vmem>>, vector<8x32xf32>
    %1 = arith.truncf %0 : vector<8x32xf32> to vector<8x32xbf16>
    %c0_1 = arith.constant 0 : index
    %c0_2 = arith.constant 0 : index
    %2 = vector.load %arg2[%c0_1, %c0_2] : memref<8x32xf32, #tpu.memory_space<vmem>>, vector<8x32xf32>
    %3 = arith.truncf %2 : vector<8x32xf32> to vector<8x32xbf16>
    %c0_3 = arith.constant 0 : index
    %c0_4 = arith.constant 0 : index
    %4 = vector.load %arg3[%c0_3, %c0_4] : memref<32x32xbf16, #tpu.memory_space<vmem>>, vector<32x32xbf16>
    %cst = arith.constant dense<0.000000e+00> : vector<8x32xf32>
    %5 = tpu.matmul %1, %4, %cst {dimension_numbers = #tpu.dot_dimension_numbers<[1], [0], [0], [1], [0, 0, 1, 1], [], []>} : vector<8x32xbf16>, vector<32x32xbf16>, vector<8x32xf32> -> vector<8x32xf32>
    %c0_5 = arith.constant 0 : index
    %c0_6 = arith.constant 0 : index
    %6 = vector.load %arg4[%c0_5, %c0_6] : memref<32x32xbf16, #tpu.memory_space<vmem>>, vector<32x32xbf16>
    %cst_7 = arith.constant dense<0.000000e+00> : vector<8x32xf32>
    %7 = tpu.matmul %3, %6, %cst_7 {dimension_numbers = #tpu.dot_dimension_numbers<[1], [0], [0], [1], [0, 0, 1, 1], [], []>} : vector<8x32xbf16>, vector<32x32xbf16>, vector<8x32xf32> -> vector<8x32xf32>
    %8 = arith.addf %5, %7 : vector<8x32xf32>
    %c0_8 = arith.constant 0 : index
    %c0_9 = arith.constant 0 : index
    %9 = vector.load %arg5[%c0_8, %c0_9] : memref<1x32xf32, #tpu.memory_space<vmem>>, vector<1x32xf32>
    %10 = vector.broadcast %9 : vector<1x32xf32> to vector<8x32xf32>
    %11 = arith.addf %8, %10 : vector<8x32xf32>
    %cst_10 = arith.constant 2.000000e-01 : f32
    %12 = vector.broadcast %cst_10 : f32 to vector<8x32xf32>
    %13 = arith.mulf %12, %11 : vector<8x32xf32>
    %14 = arith.maximumf %11, %13 : vector<8x32xf32>
    %15 = arith.truncf %14 : vector<8x32xf32> to vector<8x32xbf16>
    %c0_11 = arith.constant 0 : index
    %c0_12 = arith.constant 0 : index
    %16 = vector.load %arg6[%c0_11, %c0_12] : memref<8x32xbf16, #tpu.memory_space<vmem>>, vector<8x32xbf16>
    tpu.vector_store %arg6[%c0_11, %c0_12], %15 {strides = array<i32>} : memref<8x32xbf16, #tpu.memory_space<vmem>>, vector<8x32xbf16>,
    return
  }
  func.func @transform_0(%arg0: i32) -> (i32, i32) {
    %c0_i32 = arith.constant 0 : i32
    %c0_i32_0 = arith.constant 0 : i32
    return %arg0, %c0_i32 : i32, i32
  }
  func.func @transform_1(%arg0: i32) -> (i32, i32) {
    %c0_i32 = arith.constant 0 : i32
    %c0_i32_0 = arith.constant 0 : i32
    return %arg0, %c0_i32 : i32, i32
  }
  func.func @transform_2(%arg0: i32) -> (i32, i32) {
    %c0_i32 = arith.constant 0 : i32
    %c0_i32_0 = arith.constant 0 : i32
    %c0_i32_1 = arith.constant 0 : i32
    return %c0_i32, %c0_i32_0 : i32, i32
  }
  func.func @transform_3(%arg0: i32) -> (i32, i32) {
    %c0_i32 = arith.constant 0 : i32
    %c0_i32_0 = arith.constant 0 : i32
    %c0_i32_1 = arith.constant 0 : i32
    return %c0_i32, %c0_i32_0 : i32, i32
  }
  func.func @transform_4(%arg0: i32) -> (i32, i32) {
    %c0_i32 = arith.constant 0 : i32
    %c0_i32_0 = arith.constant 0 : i32
    %c0_i32_1 = arith.constant 0 : i32
    return %c0_i32, %c0_i32_0 : i32, i32
  }
  func.func @transform_5(%arg0: i32) -> (i32, i32) {
    %c0_i32 = arith.constant 0 : i32
    %c0_i32_0 = arith.constant 0 : i32
    return %arg0, %c0_i32 : i32, i32
  }
}

</mosaic_0001>

<bundles_post_ra>
// kernel: tpu_custom_call.1
= control target key start
LH: loop header
LB: loop body
LE: loop exit
PB: predicated region body
PF: predicated region fallthrough
CT: control target
= control target key end

     0   :  { %10 = vsyncpa [#allocation3], 0  ;;  %s488_s0 = inlined_call_operand.hbm [shape: f32[8,32], index: 0, kind: input, shape index: {}]   ;;  %s489_s1 = inlined_call_operand.hbm [shape: f32[8,32], index: 1, kind: input, shape index: {}]   ;;  %s490_s2 = inlined_call_operand.hbm [shape: bf16[32,32], index: 2, kind: input, shape index: {}]   ;;  %s491_s3 = inlined_call_operand.hbm [shape: bf16[32,32], index: 3, kind: input, shape index: {}]   ;;  %s492_s4 = inlined_call_operand.vmem [shape: f32[1,32], index: 4, kind: input, shape index: {}]   ;;  %s493_s5 = inlined_call_operand.hbm [shape: bf16[8,32], index: 5, kind: output, shape index: {}]  }
   0x1   :  { %11 = vsyncpa [#allocation6], 0 }
   0x2   :  { %12 = vsyncpa [#allocation9], 0 }
   0x3   :  { %13 = vsyncpa [#allocation4], 0  ;;  %s386_s18 = smov [#allocation5]   ;;  %s387_s20 = smov [#allocation2]  }
   0x4   :  { %s30_s19 = sshll.u32 %s386_s18, 4  ;;  %s20_s21 = sshll.u32 %s387_s20, 4  ;;  %s31_s19 = int_to_ptr.vmem [resolvable:$true] %s30_s19  ;;  %s21_s21 = int_to_ptr.vmem [resolvable:$true] %s20_s21 }
   0x5   :  { %s268_s24 = scalar_lea.hbm %s489_s1, 128 }
   0x6   :  { %p269_p0 = scmp.ne.s32.totalorder %s489_s1, %s268_s24  ;;  %p272_p1 = scmp.lt.u32.totalorder %s268_s24, %s489_s1 }
   0x8   :  { %p274_p2 = pnand %p272_p1, %p269_p0 }
   0xa   :  { %277 = shalt.err (!%p274_p2)
}
   0xb   :  { %s278_s29 = scalar_lea.vmem %s31_s19, 128  ;;  %p283_p4 = scmp.lt.s32.totalorder %s31_s19, %s31_s19 }
   0xc   :  { %p279_p3 = scmp.ne.s32.totalorder %s31_s19, %s278_s29  ;;  %p284_p5 = scmp.lt.s32.totalorder %s278_s29, %s278_s29 }
   0xe   :  { %p285_p6 = por %p284_p5, %p283_p4 }
  0x10   :  { %p286_p7 = pnand %p285_p6, %p279_p3 }
  0x12   :  { %289 = shalt.err (!%p286_p7)
}
  0x13   :  { %33 = dma.hbm_to_vmem [thread:$0]  %s489_s1, 128, %s31_s19, [#allocation6]  }
  0x14   :  { %s290_s9 = scalar_lea.hbm %s488_s0, 128 }
  0x15   :  { %p291_p8 = scmp.ne.s32.totalorder %s488_s0, %s290_s9  ;;  %p294_p9 = scmp.lt.u32.totalorder %s290_s9, %s488_s0 }
  0x17   :  { %p296_p10 = pnand %p294_p9, %p291_p8 }
  0x19   :  { %299 = shalt.err (!%p296_p10)
}
  0x1a   :  { %s300_s14 = scalar_lea.vmem %s21_s21, 128  ;;  %p305_p12 = scmp.lt.s32.totalorder %s21_s21, %s21_s21 }
  0x1b   :  { %p301_p11 = scmp.ne.s32.totalorder %s21_s21, %s300_s14  ;;  %p306_p13 = scmp.lt.s32.totalorder %s300_s14, %s300_s14 }
  0x1d   :  { %p307_p0 = por %p306_p13, %p305_p12 }
  0x1f   :  { %p308_p1 = pnand %p307_p0, %p301_p11 }
  0x21   :  { %311 = shalt.err (!%p308_p1)
}
  0x22   :  { %23 = dma.hbm_to_vmem [thread:$0]  %s488_s0, 128, %s21_s21, [#allocation3]  }
  0x23   :  { %s388_s16 = smov [#allocation7]   ;;  %s312_s20 = scalar_lea.hbm %s490_s2, 256 }
  0x24   :  { %s39_s17 = sshll.u32 %s388_s16, 4  ;;  %p313_p2 = scmp.ne.s32.totalorder %s490_s2, %s312_s20  ;;  %s40_s17 = int_to_ptr.vmem [resolvable:$true] %s39_s17 }
  0x25   :  { %p316_p3 = scmp.lt.u32.totalorder %s312_s20, %s490_s2 }
  0x27   :  { %p318_p4 = pnand %p316_p3, %p313_p2 }
  0x29   :  { %321 = shalt.err (!%p318_p4)
}
  0x2a   :  { %s322_s26 = scalar_lea.vmem %s40_s17, 256  ;;  %p327_p6 = scmp.lt.s32.totalorder %s40_s17, %s40_s17 }
  0x2b   :  { %p323_p5 = scmp.ne.s32.totalorder %s40_s17, %s322_s26  ;;  %p328_p7 = scmp.lt.s32.totalorder %s322_s26, %s322_s26 }
  0x2d   :  { %p329_p8 = por %p328_p7, %p327_p6 }
  0x2f   :  { %p330_p9 = pnand %p329_p8, %p323_p5 }
  0x31   :  { %333 = shalt.err (!%p330_p9)
}
  0x32   :  { %s389_s0 = smov 64   ;;  %s390_s21 = smov 4  }
  0x33   :  { %45 = dma.hbm_to_vmem [thread:$0]  %s490_s2, 256, %s40_s17, [#allocation6], %s389_s0, %s389_s0, %s390_s21  }
  0x34   :  { %s391_s29 = smov [#allocation8]   ;;  %s334_s8 = scalar_lea.hbm %s491_s3, 256 }
  0x35   :  { %s51_s30 = sshll.u32 %s391_s29, 4  ;;  %p335_p10 = scmp.ne.s32.totalorder %s491_s3, %s334_s8  ;;  %s52_s30 = int_to_ptr.vmem [resolvable:$true] %s51_s30 }
  0x36   :  { %p338_p11 = scmp.lt.u32.totalorder %s334_s8, %s491_s3 }
  0x38   :  { %p340_p12 = pnand %p338_p11, %p335_p10 }
  0x3a   :  { %343 = shalt.err (!%p340_p12)
}
  0x3b   :  { %s344_s13 = scalar_lea.vmem %s52_s30, 256  ;;  %p349_p0 = scmp.lt.s32.totalorder %s52_s30, %s52_s30 }
  0x3c   :  { %p345_p13 = scmp.ne.s32.totalorder %s52_s30, %s344_s13  ;;  %p350_p1 = scmp.lt.s32.totalorder %s344_s13, %s344_s13 }
  0x3e   :  { %p351_p2 = por %p350_p1, %p349_p0 }
  0x40   :  { %p352_p3 = pnand %p351_p2, %p345_p13 }
  0x42   :  { %355 = shalt.err (!%p352_p3)
}
  0x43   :  { %57 = dma.hbm_to_vmem [thread:$0]  %s491_s3, 256, %s52_s30, [#allocation9], %s389_s0, %s389_s0, %s390_s21  }
  0x44   :  { %378 = dma.done.wait [#allocation3], 128  }
  0x45   :  { %379 = vsyncadd [#allocation3], 4294967168 }
  0x46   :  { %380 = dma.done.wait [#allocation6], 384  }
  0x47   :  { %381 = vsyncadd [#allocation6], 4294966912 }
  0x48   :  { %382 = dma.done.wait [#allocation9], 256  }
  0x49   :  { %383 = vsyncadd [#allocation9], 4294967040  ;;  %v392_v0 = vmov 0.0   ;;  %vm393_vm0 = vmmov 0   ;;  %v264_v1 = vld [vmem:[#allocation8] sm:$0xff]   ;;  %v265_v2 = vld [vmem:[#allocation7] sm:$0xff]  }
  0x4a   :  { %239 = vmatprep.subr.bf16.mxu0 %v392_v0  ;;  %247 = vmatprep.subr.bf16.mxu1 %v392_v0  ;;  %v266_v3 = vld [vmem:[#allocation8 + $0x8] sm:$0xff]   ;;  %v267_v4 = vld [vmem:[#allocation7 + $0x8] sm:$0xff]   ;;  %v73_v6 = vld [vmem:[#allocation2] sm:$0xff]  ;;  %vm97_vm1 = vcmask 261120   ;;  %s394_s15 = smov [#allocation10]   ;;  %vm207_vm2 = vcmask 257024  }
  0x4b   :  { %243 = vmatprep.mubr.msk.bf16.mxu0 %vm393_vm0, %v392_v0  ;;  %251 = vmatprep.mubr.msk.bf16.mxu1 %vm393_vm0, %v392_v0  ;;  %v75_v5 = vld [vmem:[#allocation5] sm:$0xff]  ;;  %v74_v8 = vpack.c.bf16 %v73_v6, %v73_v6  ;;  %v232_v11 = vld [vmem:[%s492_s4] ss:$0 sm:$0xff]  ;;  %s215_s16 = sshll.u32 %s394_s15, 4  ;;  %s216_s16 = int_to_ptr.vmem [resolvable:$true] %s215_s16 }
  0x4c   :  { %240 = vmatpush3.bf16.msra.mxu0 %v264_v1  ;;  %248 = vmatpush3.bf16.msra.mxu1 %v265_v2  ;;  %v76_v7 = vpack.c.bf16 %v75_v5, %v75_v5  ;;  %s356_s17 = scalar_lea.vmem %s216_s16, 64  ;;  %p361_p5 = scmp.lt.s32.totalorder %s216_s16, %s216_s16 }
  0x4d   :  { %241 = vmatprep.subr.bf16.mxu0 %v392_v0  ;;  %249 = vmatprep.subr.bf16.mxu1 %v392_v0  ;;  %p357_p4 = scmp.ne.s32.totalorder %s216_s16, %s356_s17  ;;  %p362_p6 = scmp.lt.s32.totalorder %s356_s17, %s356_s17 }
  0x4f   :  { %p363_p7 = por %p362_p6, %p361_p5 }
  0x50   :  { %242 = vmatpush3.bf16.msra.mxu0 %v266_v3  ;;  %250 = vmatpush3.bf16.msra.mxu1 %v267_v4 }
  0x51   :  { %p364_p8 = pnand %p363_p7, %p357_p4 }
  0x53   :  { %244 = vmatmul.mubr.msk.bf16.vlgmr.msra.gmra.mrb[0].mxu0 %vm97_vm1, %v76_v7  ;;  %252 = vmatmul.mubr.msk.bf16.vlgmr.msra.gmra.mrb[0].mxu1 %vm97_vm1, %v74_v8 }
 0x126   :  { %v135_v9 = vpop.f32.mrb[0].mxu0  ;;  %v190_v10 = vpop.f32.mrb[0].mxu1 }
 0x127   :  { %v245_v12 = vpop.f32.mrb[1].mxu0  ;;  %v191_v13 = vadd.f32 %v190_v10, %v135_v9  ;;  %v253_v14 = vpop.f32.mrb[1].mxu1 }
 0x128   :  { %v138_v15 = vpop.f32.mrb[2].mxu0  ;;  %v193_v16 = vpop.f32.mrb[2].mxu1 }
 0x129   :  { %v246_v17 = vpop.f32.mrb[3].mxu0  ;;  %v203_v18 = vadd.f32 %v232_v11, %v191_v13  ;;  %v254_v19 = vpop.f32.mrb[3].mxu1 }
 0x12b   :  { %v204_v20 = vmul.f32 0.2, %v203_v18 }
 0x12d   :  { %v205_v21 = vmax.f32 %v203_v18, %v204_v20 }
 0x12f   :  { %v206_v22 = vpack.c.bf16 %v205_v21, %v205_v21 }
 0x131   :  { %208 = vst.msk [vmem:[#allocation10] sm:$0xf] %vm207_vm2, %v206_v22 }
 0x132   :  { %367 = shalt.err (!%p364_p8)
}
 0x133   :  { %s368_s19 = scalar_lea.hbm %s493_s5, 64 }
 0x134   :  { %p369_p9 = scmp.ne.s32.totalorder %s493_s5, %s368_s19  ;;  %p372_p10 = scmp.lt.u32.totalorder %s368_s19, %s493_s5 }
 0x136   :  { %p374_p11 = pnand %p372_p10, %p369_p9 }
 0x138   :  { %377 = shalt.err (!%p374_p11)
}
 0x139   :  { %218 = dma.vmem_to_hbm [thread:$0]  %s216_s16, 64, %s493_s5, [#allocation4]  }
 0x13a   :  { %384 = dma.done.wait [#allocation4], 64  }
 0x13b   :  { %385 = vsyncadd [#allocation4], 4294967232 }
 0x13c   :  { %222 = vsyncpa [#allocation3], 1 }
 0x13d   :  { %223 = vsyncpa [#allocation6], 1 }
 0x13e   :  { %224 = vsyncpa [#allocation9], 1 }
 0x13f   :  { %225 = vsyncpa [#allocation4], 1 }

</bundles_post_ra>
